<compile_context>
chip_gen: v5e
topology: v5e:2x2
jax: 0.10.0
libtpu: 0.0.40
codegen_flags: <defaults>
</compile_context>

<pallas_src>
import jax
import jax.numpy as jnp
from jax.experimental import pallas as pl
from jax.experimental.pallas import tpu as pltpu

L = 40           # sequence length (fc1 in_features 1280 = 32 * 40)
C1, C2 = 16, 32  # conv channel counts
K = 3            # conv kernel size
F1, F2, F3 = 64, 32, 1

BLOCK = 128      # batch-block size (nb*L = 5120 lanes per step)


# --------------------------------------------------------------------------- #
# Kernels
# --------------------------------------------------------------------------- #
def _conv_kernel(xs_ref, mask_ref, w1_ref, b1_ref, w2_ref, b2_ref, h2_ref):
    """conv1 -> ReLU -> conv2 -> ReLU on a lane-packed (C, nb*L) batch block."""
    w1 = w1_ref[...]                                        # (C1, K) f32

    # ---- conv1: 1 -> 16 channels, k=3, pad=1.  Taps are host-pre-shifted rows.
    h1 = (w1[:, 0:1] * xs_ref[0:1, :]
          + w1[:, 1:2] * xs_ref[1:2, :]
          + w1[:, 2:3] * xs_ref[2:3, :]
          + b1_ref[...])
    h1 = jnp.maximum(h1, 0.0)                               # (C1, nl); dropout1 = id

    # ---- conv2: 16 -> 32 channels, k=3, pad=1.
    # +-1 taps via lane shifts (slice+concat) plus a resident 0/1 border mask
    # that zeroes each sample's sequence boundary (samples are lane-packed, so
    # the mask also stops leakage between adjacent batch elements).
    zcol = jnp.zeros((C1, 1), dtype=h1.dtype)
    left = jnp.concatenate([zcol, h1[:, :-1]], axis=1) * mask_ref[0:1, :]   # h1[., l-1]
    right = jnp.concatenate([h1[:, 1:], zcol], axis=1) * mask_ref[1:2, :]   # h1[., l+1]

    # Merge the three taps into one bf16 MXU matmul: (C2, 3*C1) x (3*C1, nl).
    hcat = jnp.concatenate([left, h1, right], axis=0).astype(jnp.bfloat16)  # (48, nl)
    h2 = jnp.dot(w2_ref[...], hcat, preferred_element_type=jnp.float32) + b2_ref[...]
    h2 = jnp.maximum(h2, 0.0)                               # (C2, nl); dropout2 = id

    h2_ref[...] = h2.astype(h2_ref.dtype)                   # lane-dense bf16 slab out


def _fc_kernel(flat_ref, fw1_ref, fb1_ref, fw2_ref, fb2_ref, fw3_ref, fb3_ref,
               out_ref):
    """fc1 -> ReLU -> fc2 -> ReLU -> fc3 -> sigmoid on a (nb, 1280) batch block."""
    # bf16 x bf16 MXU matmuls, f32 accumulation; elementwise math stays f32.
    y = jnp.dot(flat_ref[...], fw1_ref[...], preferred_element_type=jnp.float32)
    y = jnp.maximum(y + fb1_ref[...], 0.0)                  # dropout3 = id (eval)
    y = jnp.dot(y.astype(jnp.bfloat16), fw2_ref[...],
                preferred_element_type=jnp.float32) + fb2_ref[...]
    y = jnp.maximum(y, 0.0)
    z = jnp.dot(y.astype(jnp.bfloat16), fw3_ref[...],
                preferred_element_type=jnp.float32) + fb3_ref[...]
    out_ref[...] = 1.0 / (1.0 + jnp.exp(-z))                # sigmoid


# --------------------------------------------------------------------------- #
# Wrapper
# --------------------------------------------------------------------------- #
def _round_up(x, m):
    return ((x + m - 1) // m) * m


def _pick_batch(n, pref):
    """Padded batch size and block size.  Large batches are padded to a multiple
    of `pref` (fixed, lane-aligned blocks; >=2 grid steps for N >= 2*pref); tiny
    batches are padded to a multiple of 8 and run as a single full block."""
    if n >= pref:
        return _round_up(n, pref), pref
    npad = max(8, _round_up(n, 8))
    return npad, npad


def net_conv_forward(x, params, block_batch=BLOCK):
    """x: (N, 1, L) float32 (NCL, as PyTorch Conv1d expects).  Returns (N, 1) f32."""
    (w1, b1, w2cat, b2, fw1, fb1, fw2, fb2, fw3, fb3) = params
    n = x.shape[0]
    npad, nb = _pick_batch(n, block_batch)
    nl = nb * L

    # ---- host-side layout plumbing (cheap; outside the kernels) ---------------
    x2 = x[:, 0, :]                                                  # (N, L)
    if npad != n:
        x2 = jnp.pad(x2, ((0, npad - n), (0, 0)))                    # zero-pad batch
    xp = jnp.pad(x2, ((0, 0), (1, 1)))                               # (Npad, L+2)
    # xs[k, n*L + l] = x[n, l + k - 1] (zeros at the sequence borders)
    xs = jnp.stack([xp[:, k:k + L] for k in range(K)], axis=0).reshape(K, npad * L)

    # Per-sample sequence-border masks (periodic with period L -> one block's
    # worth, VMEM-resident across all grid steps).
    l_in_seq = jnp.arange(nl, dtype=jnp.int32) % L
    mask = jnp.stack([(l_in_seq != 0), (l_in_seq != L - 1)],
                     axis=0).astype(jnp.float32)                     # (2, nl)

    conv = pl.pallas_call(
        _conv_kernel,
        out_shape=jax.ShapeDtypeStruct((C2, npad * L), jnp.bfloat16),
        grid_spec=pltpu.PrefetchScalarGridSpec(
            num_scalar_prefetch=0,
            grid=(npad // nb,),
            in_specs=[
                pl.BlockSpec((K, nl), lambda i: (0, i)),           # xs (per block)
                pl.BlockSpec((2, nl), lambda i: (0, 0)),           # border masks
                pl.BlockSpec((C1, K), lambda i: (0, 0)),           # w1 (resident)
                pl.BlockSpec((C1, 1), lambda i: (0, 0)),           # b1
                pl.BlockSpec((C2, K * C1), lambda i: (0, 0)),      # merged conv2 w
                pl.BlockSpec((C2, 1), lambda i: (0, 0)),           # b2
            ],
            out_specs=pl.BlockSpec((C2, nl), lambda i: (0, i)),
        ),
        compiler_params=pltpu.CompilerParams(
            dimension_semantics=("parallel",)),
    )
    h2 = conv(xs, mask, w1, b1, w2cat, b2)                           # (C2, Npad*L) bf16

    # torch's x.view(N, -1) channel-major flatten: one XLA transpose on the small
    # bf16 slab between the two pallas_calls (see TODO(synk) above).
    flat = h2.reshape(C2, npad, L).transpose(1, 0, 2).reshape(npad, C2 * L)

    fc = pl.pallas_call(
        _fc_kernel,
        out_shape=jax.ShapeDtypeStruct((npad, F3), jnp.float32),
        grid_spec=pltpu.PrefetchScalarGridSpec(
            num_scalar_prefetch=0,
            grid=(npad // nb,),
            in_specs=[
                pl.BlockSpec((nb, C2 * L), lambda i: (i, 0)),      # flat (per block)
                pl.BlockSpec((C2 * L, F1), lambda i: (0, 0)),      # fw1 bf16, resident
                pl.BlockSpec((1, F1), lambda i: (0, 0)),
                pl.BlockSpec((F1, F2), lambda i: (0, 0)),
                pl.BlockSpec((1, F2), lambda i: (0, 0)),
                pl.BlockSpec((F2, F3), lambda i: (0, 0)),
                pl.BlockSpec((1, F3), lambda i: (0, 0)),
            ],
            out_specs=pl.BlockSpec((nb, F3), lambda i: (i, 0)),
        ),
        compiler_params=pltpu.CompilerParams(
            dimension_semantics=("parallel",)),
    )
    out = fc(flat, fw1, fb1, fw2, fb2, fw3, fb3)                     # (Npad, 1)
    return out[:n]


# --------------------------------------------------------------------------- #
# Parameters (PyTorch-default-style init) and layout packing
# --------------------------------------------------------------------------- #
def init_params(key):
    ks = jax.random.split(key, 10)

    def u(k, shape, fan_in):
        bound = 1.0 / jnp.sqrt(jnp.float32(fan_in))
        return jax.random.uniform(k, shape, jnp.float32, -bound, bound)

    conv1_w = u(ks[0], (C1, 1, K), 1 * K)
    conv1_b = u(ks[1], (C1,), 1 * K)
    conv2_w = u(ks[2], (C2, C1, K), C1 * K)
    conv2_b = u(ks[3], (C2,), C1 * K)
    fc1_w = u(ks[4], (F1, C2 * L), C2 * L)
    fc1_b = u(ks[5], (F1,), C2 * L)
    fc2_w = u(ks[6], (F2, F1), F1)
    fc2_b = u(ks[7], (F2,), F1)
    fc3_w = u(ks[8], (F3, F2), F2)
    fc3_b = u(ks[9], (F3,), F2)
    return (conv1_w, conv1_b, conv2_w, conv2_b,
            fc1_w, fc1_b, fc2_w, fc2_b, fc3_w, fc3_b)


def pack_params(raw):
    """Rearrange PyTorch-shaped parameters into the layouts the kernels consume."""
    (c1w, c1b, c2w, c2b, f1w, f1b, f2w, f2b, f3w, f3b) = raw
    w1 = c1w[:, 0, :]                                       # (16, 3) f32
    b1 = c1b[:, None]                                       # (16, 1) f32
    # Merged-tap conv2 weight: w2cat[d, k*C1 + c] = conv2_w[d, c, k], bf16 for MXU.
    w2cat = jnp.transpose(c2w, (0, 2, 1)).reshape(C2, K * C1).astype(jnp.bfloat16)
    b2 = c2b[:, None]                                       # (32, 1) f32
    fw1 = f1w.T.astype(jnp.bfloat16)                        # (1280, 64) bf16
    fb1 = f1b[None, :]                                      # (1, 64) f32
    fw2 = f2w.T.astype(jnp.bfloat16)                        # (64, 32) bf16
    fb2 = f2b[None, :]                                      # (1, 32) f32
    fw3 = f3w.T.astype(jnp.bfloat16)                        # (32, 1) bf16
    fb3 = f3b[None, :]                                      # (1, 1) f32
    return (w1, b1, w2cat, b2, fw1, fb1, fw2, fb2, fw3, fb3)


def reference_forward(x, raw):
    """Pure-JAX f32 reference with PyTorch semantics (eval mode, dropout = id)."""
    (c1w, c1b, c2w, c2b, f1w, f1b, f2w, f2b, f3w, f3b) = raw
    xp = jnp.pad(x[:, 0, :], ((0, 0), (1, 1)))                          # (N, L+2)
    p1 = jnp.stack([xp[:, k:k + L] for k in range(K)], axis=-1)         # (N, L, 3)
    h1 = jnp.einsum('nlk,ck->ncl', p1, c1w[:, 0, :]) + c1b[None, :, None]
    h1 = jax.nn.relu(h1)
    h1p = jnp.pad(h1, ((0, 0), (0, 0), (1, 1)))
    p2 = jnp.stack([h1p[:, :, k:k + L] for k in range(K)], axis=-1)     # (N, 16, L, 3)
    h2 = jax.nn.relu(jnp.einsum('nclk,dck->ndl', p2, c2w) + c2b[None, :, None])
    flat = h2.reshape(x.shape[0], -1)                                   # (N, 1280)
    y = jax.nn.relu(flat @ f1w.T + f1b)
    y = jax.nn.relu(y @ f2w.T + f2b)
    return jax.nn.sigmoid(y @ f3w.T + f3b)


if __name__ == "__main__":
    N = 2
    key = jax.random.PRNGKey(0)
    k_param, k_x = jax.random.split(key)
    raw = init_params(k_param)
    params = pack_params(raw)
    x = jax.random.normal(k_x, (N, 1, L), jnp.float32)   # (batch=2, channels=1, seq=40)

    fwd = jax.jit(net_conv_forward)
    out = jax.block_until_ready(fwd(x, params))
    ref = reference_forward(x, raw)

    assert out.shape == (N, F3), out.shape
    assert jnp.allclose(out, ref, atol=1e-2, rtol=1e-2), (out, ref)
    print("KERNEL_OK")
</pallas_src>

<mosaic_0001>
module attributes {stable_mosaic.version = 11 : i64} {
  func.func @_conv_kernel(%arg0: i32, %arg1: memref<3x320xf32, #tpu.memory_space<vmem>>, %arg2: memref<2x320xf32, #tpu.memory_space<vmem>>, %arg3: memref<16x3xf32, #tpu.memory_space<vmem>>, %arg4: memref<16x1xf32, #tpu.memory_space<vmem>>, %arg5: memref<32x48xbf16, #tpu.memory_space<vmem>>, %arg6: memref<32x1xf32, #tpu.memory_space<vmem>>, %arg7: memref<32x320xbf16, #tpu.memory_space<vmem>>) attributes {dimension_semantics = [#tpu.dimension_semantics<parallel>], iteration_bounds = array<i64: 1>, scalar_prefetch = 0 : i64, scratch_operands = 0 : i64, tpu.core_type = #tpu.core_type<tc>, window_params = [{transform_indices = @transform_0, window_bounds = array<i64: 3, 320>}, {pipeline_mode = #tpu.pipeline_mode<synchronous>, transform_indices = @transform_1, window_bounds = array<i64: 2, 320>}, {pipeline_mode = #tpu.pipeline_mode<synchronous>, transform_indices = @transform_2, window_bounds = array<i64: 16, 3>}, {pipeline_mode = #tpu.pipeline_mode<synchronous>, transform_indices = @transform_3, window_bounds = array<i64: 16, 1>}, {pipeline_mode = #tpu.pipeline_mode<synchronous>, transform_indices = @transform_4, window_bounds = array<i64: 32, 48>}, {pipeline_mode = #tpu.pipeline_mode<synchronous>, transform_indices = @transform_5, window_bounds = array<i64: 32, 1>}, {transform_indices = @transform_6, window_bounds = array<i64: 32, 320>}]} {
    %c0 = arith.constant 0 : index
    %c0_0 = arith.constant 0 : index
    %0 = vector.load %arg3[%c0, %c0_0] : memref<16x3xf32, #tpu.memory_space<vmem>>, vector<16x3xf32>
    %1 = vector.extract_strided_slice %0 {offsets = [0, 0], sizes = [16, 1], strides = [1, 1]} : vector<16x3xf32> to vector<16x1xf32>
    %c0_1 = arith.constant 0 : index
    %c0_2 = arith.constant 0 : index
    %2 = vector.load %arg1[%c0_1, %c0_2] : memref<3x320xf32, #tpu.memory_space<vmem>>, vector<1x320xf32>
    %3 = vector.broadcast %1 : vector<16x1xf32> to vector<16x320xf32>
    %4 = vector.broadcast %2 : vector<1x320xf32> to vector<16x320xf32>
    %5 = arith.mulf %3, %4 : vector<16x320xf32>
    %6 = vector.extract_strided_slice %0 {offsets = [0, 1], sizes = [16, 1], strides = [1, 1]} : vector<16x3xf32> to vector<16x1xf32>
    %c1 = arith.constant 1 : index
    %c0_3 = arith.constant 0 : index
    %7 = vector.load %arg1[%c1, %c0_3] : memref<3x320xf32, #tpu.memory_space<vmem>>, vector<1x320xf32>
    %8 = vector.broadcast %6 : vector<16x1xf32> to vector<16x320xf32>
    %9 = vector.broadcast %7 : vector<1x320xf32> to vector<16x320xf32>
    %10 = arith.mulf %8, %9 : vector<16x320xf32>
    %11 = arith.addf %5, %10 : vector<16x320xf32>
    %12 = vector.extract_strided_slice %0 {offsets = [0, 2], sizes = [16, 1], strides = [1, 1]} : vector<16x3xf32> to vector<16x1xf32>
    %c2 = arith.constant 2 : index
    %c0_4 = arith.constant 0 : index
    %13 = vector.load %arg1[%c2, %c0_4] : memref<3x320xf32, #tpu.memory_space<vmem>>, vector<1x320xf32>
    %14 = vector.broadcast %12 : vector<16x1xf32> to vector<16x320xf32>
    %15 = vector.broadcast %13 : vector<1x320xf32> to vector<16x320xf32>
    %16 = arith.mulf %14, %15 : vector<16x320xf32>
    %17 = arith.addf %11, %16 : vector<16x320xf32>
    %c0_5 = arith.constant 0 : index
    %c0_6 = arith.constant 0 : index
    %18 = vector.load %arg4[%c0_5, %c0_6] : memref<16x1xf32, #tpu.memory_space<vmem>>, vector<16x1xf32>
    %19 = vector.broadcast %18 : vector<16x1xf32> to vector<16x320xf32>
    %20 = arith.addf %17, %19 : vector<16x320xf32>
    %cst = arith.constant 0.000000e+00 : f32
    %21 = vector.broadcast %cst : f32 to vector<16x320xf32>
    %22 = arith.maximumf %20, %21 : vector<16x320xf32>
    %cst_7 = arith.constant 0.000000e+00 : f32
    %23 = vector.broadcast %cst_7 : f32 to vector<16x1xf32>
    %24 = vector.extract_strided_slice %22 {offsets = [0, 0], sizes = [16, 319], strides = [1, 1]} : vector<16x320xf32> to vector<16x319xf32>
    %25 = tpu.concatenate %23, %24 in 1 : vector<16x1xf32>, vector<16x319xf32> -> vector<16x320xf32>
    %c0_8 = arith.constant 0 : index
    %c0_9 = arith.constant 0 : index
    %26 = vector.load %arg2[%c0_8, %c0_9] : memref<2x320xf32, #tpu.memory_space<vmem>>, vector<1x320xf32>
    %27 = vector.broadcast %26 : vector<1x320xf32> to vector<16x320xf32>
    %28 = arith.mulf %25, %27 : vector<16x320xf32>
    %29 = vector.extract_strided_slice %22 {offsets = [0, 1], sizes = [16, 319], strides = [1, 1]} : vector<16x320xf32> to vector<16x319xf32>
    %30 = tpu.concatenate %29, %23 in 1 : vector<16x319xf32>, vector<16x1xf32> -> vector<16x320xf32>
    %c1_10 = arith.constant 1 : index
    %c0_11 = arith.constant 0 : index
    %31 = vector.load %arg2[%c1_10, %c0_11] : memref<2x320xf32, #tpu.memory_space<vmem>>, vector<1x320xf32>
    %32 = vector.broadcast %31 : vector<1x320xf32> to vector<16x320xf32>
    %33 = arith.mulf %30, %32 : vector<16x320xf32>
    %34 = tpu.concatenate %28, %22, %33 in 0 : vector<16x320xf32>, vector<16x320xf32>, vector<16x320xf32> -> vector<48x320xf32>
    %35 = arith.truncf %34 : vector<48x320xf32> to vector<48x320xbf16>
    %c0_12 = arith.constant 0 : index
    %c0_13 = arith.constant 0 : index
    %36 = vector.load %arg5[%c0_12, %c0_13] : memref<32x48xbf16, #tpu.memory_space<vmem>>, vector<32x48xbf16>
    %cst_14 = arith.constant dense<0.000000e+00> : vector<32x320xf32>
    %37 = tpu.matmul %36, %35, %cst_14 {dimension_numbers = #tpu.dot_dimension_numbers<[1], [0], [0], [1], [0, 0, 1, 1], [], []>} : vector<32x48xbf16>, vector<48x320xbf16>, vector<32x320xf32> -> vector<32x320xf32>
    %c0_15 = arith.constant 0 : index
    %c0_16 = arith.constant 0 : index
    %38 = vector.load %arg6[%c0_15, %c0_16] : memref<32x1xf32, #tpu.memory_space<vmem>>, vector<32x1xf32>
    %39 = vector.broadcast %38 : vector<32x1xf32> to vector<32x320xf32>
    %40 = arith.addf %37, %39 : vector<32x320xf32>
    %cst_17 = arith.constant 0.000000e+00 : f32
    %41 = vector.broadcast %cst_17 : f32 to vector<32x320xf32>
    %42 = arith.maximumf %40, %41 : vector<32x320xf32>
    %43 = arith.truncf %42 : vector<32x320xf32> to vector<32x320xbf16>
    %c0_18 = arith.constant 0 : index
    %c0_19 = arith.constant 0 : index
    %44 = vector.load %arg7[%c0_18, %c0_19] : memref<32x320xbf16, #tpu.memory_space<vmem>>, vector<32x320xbf16>
    tpu.vector_store %arg7[%c0_18, %c0_19], %43 {strides = array<i32>} : memref<32x320xbf16, #tpu.memory_space<vmem>>, vector<32x320xbf16>,
    return
  }
  func.func @transform_0(%arg0: i32) -> (i32, i32) {
    %c0_i32 = arith.constant 0 : i32
    %c0_i32_0 = arith.constant 0 : i32
    return %c0_i32, %arg0 : i32, i32
  }
  func.func @transform_1(%arg0: i32) -> (i32, i32) {
    %c0_i32 = arith.constant 0 : i32
    %c0_i32_0 = arith.constant 0 : i32
    %c0_i32_1 = arith.constant 0 : i32
    return %c0_i32, %c0_i32_0 : i32, i32
  }
  func.func @transform_2(%arg0: i32) -> (i32, i32) {
    %c0_i32 = arith.constant 0 : i32
    %c0_i32_0 = arith.constant 0 : i32
    %c0_i32_1 = arith.constant 0 : i32
    return %c0_i32, %c0_i32_0 : i32, i32
  }
  func.func @transform_3(%arg0: i32) -> (i32, i32) {
    %c0_i32 = arith.constant 0 : i32
    %c0_i32_0 = arith.constant 0 : i32
    %c0_i32_1 = arith.constant 0 : i32
    return %c0_i32, %c0_i32_0 : i32, i32
  }
  func.func @transform_4(%arg0: i32) -> (i32, i32) {
    %c0_i32 = arith.constant 0 : i32
    %c0_i32_0 = arith.constant 0 : i32
    %c0_i32_1 = arith.constant 0 : i32
    return %c0_i32, %c0_i32_0 : i32, i32
  }
  func.func @transform_5(%arg0: i32) -> (i32, i32) {
    %c0_i32 = arith.constant 0 : i32
    %c0_i32_0 = arith.constant 0 : i32
    %c0_i32_1 = arith.constant 0 : i32
    return %c0_i32, %c0_i32_0 : i32, i32
  }
  func.func @transform_6(%arg0: i32) -> (i32, i32) {
    %c0_i32 = arith.constant 0 : i32
    %c0_i32_0 = arith.constant 0 : i32
    return %c0_i32, %arg0 : i32, i32
  }
}

module attributes {stable_mosaic.version = 11 : i64} {
  func.func @_fc_kernel(%arg0: i32, %arg1: memref<8x1280xbf16, #tpu.memory_space<vmem>>, %arg2: memref<1280x64xbf16, #tpu.memory_space<vmem>>, %arg3: memref<1x64xf32, #tpu.memory_space<vmem>>, %arg4: memref<64x32xbf16, #tpu.memory_space<vmem>>, %arg5: memref<1x32xf32, #tpu.memory_space<vmem>>, %arg6: memref<32x1xbf16, #tpu.memory_space<vmem>>, %arg7: memref<1x1xf32, #tpu.memory_space<vmem>>, %arg8: memref<8x1xf32, #tpu.memory_space<vmem>>) attributes {dimension_semantics = [#tpu.dimension_semantics<parallel>], iteration_bounds = array<i64: 1>, scalar_prefetch = 0 : i64, scratch_operands = 0 : i64, tpu.core_type = #tpu.core_type<tc>, window_params = [{transform_indices = @transform_0, window_bounds = array<i64: 8, 1280>}, {pipeline_mode = #tpu.pipeline_mode<synchronous>, transform_indices = @transform_1, window_bounds = array<i64: 1280, 64>}, {pipeline_mode = #tpu.pipeline_mode<synchronous>, transform_indices = @transform_2, window_bounds = array<i64: 1, 64>}, {pipeline_mode = #tpu.pipeline_mode<synchronous>, transform_indices = @transform_3, window_bounds = array<i64: 64, 32>}, {pipeline_mode = #tpu.pipeline_mode<synchronous>, transform_indices = @transform_4, window_bounds = array<i64: 1, 32>}, {pipeline_mode = #tpu.pipeline_mode<synchronous>, transform_indices = @transform_5, window_bounds = array<i64: 32, 1>}, {pipeline_mode = #tpu.pipeline_mode<synchronous>, transform_indices = @transform_6, window_bounds = array<i64: 1, 1>}, {transform_indices = @transform_7, window_bounds = array<i64: 8, 1>}]} {
    %c0 = arith.constant 0 : index
    %c0_0 = arith.constant 0 : index
    %0 = vector.load %arg1[%c0, %c0_0] : memref<8x1280xbf16, #tpu.memory_space<vmem>>, vector<8x1280xbf16>
    %c0_1 = arith.constant 0 : index
    %c0_2 = arith.constant 0 : index
    %1 = vector.load %arg2[%c0_1, %c0_2] : memref<1280x64xbf16, #tpu.memory_space<vmem>>, vector<1280x64xbf16>
    %cst = arith.constant dense<0.000000e+00> : vector<8x64xf32>
    %2 = tpu.matmul %0, %1, %cst {dimension_numbers = #tpu.dot_dimension_numbers<[1], [0], [0], [1], [0, 0, 1, 1], [], []>} : vector<8x1280xbf16>, vector<1280x64xbf16>, vector<8x64xf32> -> vector<8x64xf32>
    %c0_3 = arith.constant 0 : index
    %c0_4 = arith.constant 0 : index
    %3 = vector.load %arg3[%c0_3, %c0_4] : memref<1x64xf32, #tpu.memory_space<vmem>>, vector<1x64xf32>
    %4 = vector.broadcast %3 : vector<1x64xf32> to vector<8x64xf32>
    %5 = arith.addf %2, %4 : vector<8x64xf32>
    %cst_5 = arith.constant 0.000000e+00 : f32
    %6 = vector.broadcast %cst_5 : f32 to vector<8x64xf32>
    %7 = arith.maximumf %5, %6 : vector<8x64xf32>
    %8 = arith.truncf %7 : vector<8x64xf32> to vector<8x64xbf16>
    %c0_6 = arith.constant 0 : index
    %c0_7 = arith.constant 0 : index
    %9 = vector.load %arg4[%c0_6, %c0_7] : memref<64x32xbf16, #tpu.memory_space<vmem>>, vector<64x32xbf16>
    %cst_8 = arith.constant dense<0.000000e+00> : vector<8x32xf32>
    %10 = tpu.matmul %8, %9, %cst_8 {dimension_numbers = #tpu.dot_dimension_numbers<[1], [0], [0], [1], [0, 0, 1, 1], [], []>} : vector<8x64xbf16>, vector<64x32xbf16>, vector<8x32xf32> -> vector<8x32xf32>
    %c0_9 = arith.constant 0 : index
    %c0_10 = arith.constant 0 : index
    %11 = vector.load %arg5[%c0_9, %c0_10] : memref<1x32xf32, #tpu.memory_space<vmem>>, vector<1x32xf32>
    %12 = vector.broadcast %11 : vector<1x32xf32> to vector<8x32xf32>
    %13 = arith.addf %10, %12 : vector<8x32xf32>
    %cst_11 = arith.constant 0.000000e+00 : f32
    %14 = vector.broadcast %cst_11 : f32 to vector<8x32xf32>
    %15 = arith.maximumf %13, %14 : vector<8x32xf32>
    %16 = arith.truncf %15 : vector<8x32xf32> to vector<8x32xbf16>
    %c0_12 = arith.constant 0 : index
    %c0_13 = arith.constant 0 : index
    %17 = vector.load %arg6[%c0_12, %c0_13] : memref<32x1xbf16, #tpu.memory_space<vmem>>, vector<32x1xbf16>
    %cst_14 = arith.constant dense<0.000000e+00> : vector<8x1xf32>
    %18 = tpu.matmul %16, %17, %cst_14 {dimension_numbers = #tpu.dot_dimension_numbers<[1], [0], [0], [1], [0, 0, 1, 1], [], []>} : vector<8x32xbf16>, vector<32x1xbf16>, vector<8x1xf32> -> vector<8x1xf32>
    %c0_15 = arith.constant 0 : index
    %c0_16 = arith.constant 0 : index
    %19 = vector.load %arg7[%c0_15, %c0_16] : memref<1x1xf32, #tpu.memory_space<vmem>>, vector<1x1xf32>
    %20 = vector.broadcast %19 : vector<1x1xf32> to vector<8x1xf32>
    %21 = arith.addf %18, %20 : vector<8x1xf32>
    %cst_17 = arith.constant 0.000000e+00 : f32
    %22 = vector.broadcast %cst_17 : f32 to vector<8x1xf32>
    %23 = arith.subf %22, %21 : vector<8x1xf32>
    %24 = math.exp %23 : vector<8x1xf32>
    %cst_18 = arith.constant 1.000000e+00 : f32
    %25 = vector.broadcast %cst_18 : f32 to vector<8x1xf32>
    %26 = arith.addf %25, %24 : vector<8x1xf32>
    %cst_19 = arith.constant 1.000000e+00 : f32
    %27 = vector.broadcast %cst_19 : f32 to vector<8x1xf32>
    %28 = arith.divf %27, %26 : vector<8x1xf32>
    %c0_20 = arith.constant 0 : index
    %c0_21 = arith.constant 0 : index
    %29 = vector.load %arg8[%c0_20, %c0_21] : memref<8x1xf32, #tpu.memory_space<vmem>>, vector<8x1xf32>
    tpu.vector_store %arg8[%c0_20, %c0_21], %28 {strides = array<i32>} : memref<8x1xf32, #tpu.memory_space<vmem>>, vector<8x1xf32>,
    return
  }
  func.func @transform_0(%arg0: i32) -> (i32, i32) {
    %c0_i32 = arith.constant 0 : i32
    %c0_i32_0 = arith.constant 0 : i32
    return %arg0, %c0_i32 : i32, i32
  }
  func.func @transform_1(%arg0: i32) -> (i32, i32) {
    %c0_i32 = arith.constant 0 : i32
    %c0_i32_0 = arith.constant 0 : i32
    %c0_i32_1 = arith.constant 0 : i32
    return %c0_i32, %c0_i32_0 : i32, i32
  }
  func.func @transform_2(%arg0: i32) -> (i32, i32) {
    %c0_i32 = arith.constant 0 : i32
    %c0_i32_0 = arith.constant 0 : i32
    %c0_i32_1 = arith.constant 0 : i32
    return %c0_i32, %c0_i32_0 : i32, i32
  }
  func.func @transform_3(%arg0: i32) -> (i32, i32) {
    %c0_i32 = arith.constant 0 : i32
    %c0_i32_0 = arith.constant 0 : i32
    %c0_i32_1 = arith.constant 0 : i32
    return %c0_i32, %c0_i32_0 : i32, i32
  }
  func.func @transform_4(%arg0: i32) -> (i32, i32) {
    %c0_i32 = arith.constant 0 : i32
    %c0_i32_0 = arith.constant 0 : i32
    %c0_i32_1 = arith.constant 0 : i32
    return %c0_i32, %c0_i32_0 : i32, i32
  }
  func.func @transform_5(%arg0: i32) -> (i32, i32) {
    %c0_i32 = arith.constant 0 : i32
    %c0_i32_0 = arith.constant 0 : i32
    %c0_i32_1 = arith.constant 0 : i32
    return %c0_i32, %c0_i32_0 : i32, i32
  }
  func.func @transform_6(%arg0: i32) -> (i32, i32) {
    %c0_i32 = arith.constant 0 : i32
    %c0_i32_0 = arith.constant 0 : i32
    %c0_i32_1 = arith.constant 0 : i32
    return %c0_i32, %c0_i32_0 : i32, i32
  }
  func.func @transform_7(%arg0: i32) -> (i32, i32) {
    %c0_i32 = arith.constant 0 : i32
    %c0_i32_0 = arith.constant 0 : i32
    return %arg0, %c0_i32 : i32, i32
  }
}

</mosaic_0001>

<bundles_post_ra>
// kernel: net_conv_forward.2
= control target key start
LH: loop header
LB: loop body
LE: loop exit
PB: predicated region body
PF: predicated region fallthrough
CT: control target
= control target key end

     0   :  { %v394_v0 = vmov 1   ;;  %v395_v1 = vmov 0   ;;  %v396_v3 = vmov 2   ;;  %vm200_vm0 = vcmask 515072   ;;  %s527_s2 = inlined_call_operand.vmem [shape: f32[16,3], index: 2, kind: input, shape index: {}]   ;;  %s528_s3 = inlined_call_operand.vmem [shape: f32[16,1], index: 3, kind: input, shape index: {}]   ;;  %s529_s0 = inlined_call_operand.vmem [shape: f32[3,320], index: 0, kind: input, shape index: {}]   ;;  %s530_s5 = inlined_call_operand.vmem [shape: f32[32,1], index: 5, kind: input, shape index: {}]   ;;  %s531_s1 = inlined_call_operand.vmem [shape: f32[2,320], index: 1, kind: input, shape index: {}]   ;;  %s532_s4 = inlined_call_operand.vmem [shape: bf16[32,48], index: 4, kind: input, shape index: {}]   ;;  %s533_s6 = inlined_call_operand.vmem [shape: bf16[32,320], index: 6, kind: output, shape index: {}]  }
   0x1   :  { %390 = vset.pattern.permute.xlu1 %v394_v0  ;;  %389 = vset.pattern.permute.xlu0 %v395_v1  ;;  %v24_v2 = vld [vmem:[%s527_s2] sm:$0xff]  ;;  %v25_v4 = vld [vmem:[%s527_s2 + $0x8] sm:$0xff]  ;;  %vm189_vm1 = vcmask 1039360   ;;  %vm150_vm2 = vcmask 7168   ;;  %vm265_vm3 = vcmask 392192   ;;  %vm350_vm4 = vcmask 519168  }
   0x2   :  { %53 = vperm.xlu1 %390, %v24_v2   ;;  %29 = vperm.xlu0 %389, %v24_v2   ;;  %v108_v5 = vld [vmem:[%s528_s3] sm:$0xff]  ;;  %v109_v6 = vld [vmem:[%s528_s3 + $0x8] sm:$0xff]  ;;  %s398_s3 = smov 1  }
   0x3   :  { %391 = vset.pattern.permute.xlu2 %v396_v3  ;;  %v362_v7 = vld [vmem:[%s529_s0 + $0x1] ss:$4 sm:$0x7]  ;;  %v26_v10 = vld [vmem:[%s529_s0] ss:$4 sm:$0x7] }
   0x4   :  { %82 = vperm.xlu2 %391, %v24_v2   ;;  %v363_v12 = vld [vmem:[%s529_s0 + $0x2] ss:$4 sm:$0x7]  ;;  %v61_v13 = vperm.slane %v362_v7, 0  ;;  %v62_v14 = vperm.slane %v362_v7, 1  ;;  %v63_v15 = vperm.slane %v362_v7, 2 }
   0x5   :  { %v38_v16 = vperm.slane %v26_v10, 0  ;;  %v39_v17 = vperm.slane %v26_v10, 1  ;;  %v40_v18 = vperm.slane %v26_v10, 2  ;;  %v90_v19 = vperm.slane %v363_v12, 0  ;;  %s397_s0 = smov 127  }
   0x6   :  { %v91_v20 = vperm.slane %v363_v12, 1  ;;  %v92_v21 = vperm.slane %v363_v12, 2  ;;  %v364_v12 = vld [vmem:[%s531_s1 + $0x1] ss:$2 sm:$0x7] }
   0xa   :  { %57 = vperm.xlu1 %390, %v25_v4   ;;  %34 = vperm.xlu0 %389, %v25_v4  }
   0xc   :  { %86 = vperm.xlu2 %391, %v25_v4  }
  0x12   :  { %392 = vset.pattern.permute.xlu1 %v395_v1  ;;  %112 = vperm.xlu0 %389, %v108_v5  }
  0x13   :  { %117 = vperm.xlu1 %392, %v109_v6  }
  0x14   :  { %393 = vset.pattern.permute.xlu2 %v395_v1 }
  0x5e   :  { %v83_v11 = vpop.permute.xlu2 %82 }
  0x5f   :  { %v96_v34 = vmul.f32 %v90_v19, %v83_v11  ;;  %v97_v35 = vmul.f32 %v91_v20, %v83_v11  ;;  %v98_v38 = vmul.f32 %v92_v21, %v83_v11 }
  0x66   :  { %v87_v42 = vpop.permute.xlu2 %86 }
  0x67   :  { %v99_v46 = vmul.f32 %v90_v19, %v87_v42  ;;  %v100_v47 = vmul.f32 %v91_v20, %v87_v42  ;;  %v101_v48 = vmul.f32 %v92_v21, %v87_v42 }
  0x74   :  { %v54_v8 = vpop.permute.xlu1 %53  ;;  %v30_v9 = vpop.permute.xlu0 %29 }
  0x75   :  { %v67_v22 = vmul.f32 %v61_v13, %v54_v8  ;;  %v68_v23 = vmul.f32 %v62_v14, %v54_v8  ;;  %v69_v24 = vmul.f32 %v63_v15, %v54_v8  ;;  %v44_v25 = vmul.f32 %v38_v16, %v30_v9  ;;  %v233_v8 = vld [vmem:[%s530_s5 + $0x10] sm:$0xff] }
  0x76   :  { %v45_v26 = vmul.f32 %v39_v17, %v30_v9  ;;  %v46_v27 = vmul.f32 %v40_v18, %v30_v9  ;;  %v232_v9 = vld [vmem:[%s530_s5 + $0x8] sm:$0xff] }
  0x77   :  { %v73_v39 = vadd.f32 %v67_v22, %v44_v25 }
  0x78   :  { %v74_v40 = vadd.f32 %v68_v23, %v45_v26  ;;  %v75_v41 = vadd.f32 %v69_v24, %v46_v27 }
  0x79   :  { %v102_v49 = vadd.f32 %v96_v34, %v73_v39 }
  0x7a   :  { %v103_v50 = vadd.f32 %v97_v35, %v74_v40  ;;  %v104_v51 = vadd.f32 %v98_v38, %v75_v41  ;;  %v234_v40 = vld [vmem:[%s530_s5 + $0x18] sm:$0xff] }
  0x7c   :  { %v58_v28 = vpop.permute.xlu1 %57  ;;  %v35_v29 = vpop.permute.xlu0 %34 }
  0x7d   :  { %v70_v30 = vmul.f32 %v61_v13, %v58_v28  ;;  %v71_v31 = vmul.f32 %v62_v14, %v58_v28  ;;  %v72_v32 = vmul.f32 %v63_v15, %v58_v28  ;;  %v47_v33 = vmul.f32 %v38_v16, %v35_v29 }
  0x7e   :  { %v48_v36 = vmul.f32 %v39_v17, %v35_v29  ;;  %v49_v37 = vmul.f32 %v40_v18, %v35_v29  ;;  %v207_v13 = vperm.slane %v364_v12, 1  ;;  %v208_v14 = vperm.slane %v364_v12, 2 }
  0x7f   :  { %v76_v43 = vadd.f32 %v70_v30, %v47_v33  ;;  %v163_v30 = vld [vmem:[%s531_s1] ss:$2 sm:$0x7] }
  0x80   :  { %v77_v44 = vadd.f32 %v71_v31, %v48_v36  ;;  %v78_v45 = vadd.f32 %v72_v32, %v49_v37  ;;  %v231_v31 = vld [vmem:[%s530_s5] sm:$0xff]  ;;  %v166_v33 = vperm.slane %v163_v30, 1  ;;  %v167_v35 = vperm.slane %v163_v30, 2 }
  0x81   :  { %v105_v53 = vadd.f32 %v99_v46, %v76_v43 }
  0x82   :  { %v106_v54 = vadd.f32 %v100_v47, %v77_v44  ;;  %v107_v55 = vadd.f32 %v101_v48, %v78_v45  ;;  %v379_v48 = vld [vmem:[%s532_s4] sm:$0xff] }
  0x84   :  { %v113_v52 = vpop.permute.xlu0 %112 }
  0x85   :  { %v120_v56 = vadd.f32 %v113_v52, %v102_v49  ;;  %v121_v57 = vadd.f32 %v113_v52, %v103_v50  ;;  %v122_v58 = vadd.f32 %v113_v52, %v104_v51  ;;  %v118_v59 = vpop.permute.xlu1 %117  ;;  %v206_v49 = vperm.slane %v364_v12, 0 }
  0x86   :  { %v123_v60 = vadd.f32 %v118_v59, %v105_v53  ;;  %v124_v61 = vadd.f32 %v118_v59, %v106_v54  ;;  %v125_v62 = vadd.f32 %v118_v59, %v107_v55 }
  0x87   :  { %v128_v63 = vmax.f32 %v122_v58, 0.0  ;;  %v127_v0 = vmax.f32 %v121_v57, 0.0  ;;  %v126_v1 = vmax.f32 %v120_v56, 0.0  ;;  %v165_v58 = vperm.slane %v163_v30, 0 }
  0x88   :  { %v131_v2 = vmax.f32 %v125_v62, 0.0  ;;  %v130_v3 = vmax.f32 %v124_v61, 0.0  ;;  %v129_v4 = vmax.f32 %v123_v60, 0.0 }
  0x89   :  { %181 = vrot.lane.b32.xlu2 %v128_v63, %s397_s0  ;;  %179 = vrot.lane.b32.xlu1 %v127_v0, %s397_s0 }
  0x8a   :  { %187 = vrot.lane.b32.xlu0 %v131_v2, %s397_s0  ;;  %v222_v5 = vpack.c.bf16 %v130_v3, %v127_v0  ;;  %v223_v6 = vpack.c.bf16 %v131_v2, %v128_v63  ;;  %v455_v7 = vpack.c.bf16 %v129_v4, %v126_v1 }
  0x91   :  { %185 = vrot.lane.b32.xlu2 %v130_v3, %s397_s0  ;;  %142 = vrot.lane.b32.xlu1 %v128_v63, %s398_s3  ;;  %v380_v63 = vld [vmem:[%s532_s4 + $0x8] sm:$0xff] }
  0x92   :  { %140 = vrot.lane.b32.xlu0 %v127_v0, %s398_s3 }
  0x99   :  { %146 = vrot.lane.b32.xlu2 %v130_v3, %s398_s3  ;;  %138 = vrot.lane.b32.xlu1 %v126_v1, %s398_s3 }
  0x9a   :  { %148 = vrot.lane.b32.xlu0 %v131_v2, %s398_s3 }
  0xa1   :  { %144 = vrot.lane.b32.xlu2 %v129_v4, %s398_s3  ;;  %183 = vrot.lane.b32.xlu1 %v129_v4, %s397_s0 }
  0xa2   :  { %177 = vrot.lane.b32.xlu0 %v126_v1, %s397_s0 }
  0xa9   :  { %247 = vperm.xlu1 %392, %v233_v8   ;;  %237 = vperm.xlu2 %393, %v231_v31  }
  0xaa   :  { %242 = vperm.xlu0 %389, %v232_v9  }
  0xb1   :  { %252 = vperm.xlu2 %393, %v234_v40  }
  0xe3   :  { %v182_v10 = vpop.permute.xlu2 %181 }
  0xe4   :  { %v201_v15 = vsel %vm200_vm0, %v182_v10, 0.0 }
  0xe5   :  { %v214_v24 = vmul.f32 %v208_v14, %v201_v15 }
  0xeb   :  { %v186_v11 = vpop.permute.xlu2 %185 }
  0xf3   :  { %v147_v19 = vpop.permute.xlu2 %146 }
  0xfb   :  { %v180_v16 = vpop.permute.xlu1 %179  ;;  %v145_v32 = vpop.permute.xlu2 %144 }
  0xfc   :  { %v191_v17 = vsel %vm189_vm1, %v180_v16, %v182_v10  ;;  %v188_v18 = vpop.permute.xlu0 %187  ;;  %v153_v34 = vsel %vm150_vm2, %v145_v32, %v147_v19  ;;  %v162_v59 = vsel %vm150_vm2, 0.0, %v145_v32 }
  0xfd   :  { %v193_v20 = vsel %vm189_vm1, %v186_v11, %v188_v18  ;;  %v202_v21 = vsel %vm200_vm0, %v188_v18, 0.0  ;;  %v213_v22 = vmul.f32 %v207_v13, %v191_v17  ;;  %v175_v41 = vmul.f32 %v166_v33, %v153_v34 }
  0xfe   :  { %v216_v23 = vmul.f32 %v207_v13, %v193_v20  ;;  %v217_v25 = vmul.f32 %v208_v14, %v202_v21  ;;  %v174_v61 = vmul.f32 %v165_v58, %v162_v59 }
 0x100   :  { %v225_v26 = vpack.c.bf16 %v216_v23, %v213_v22  ;;  %v226_v27 = vpack.c.bf16 %v217_v25, %v214_v24 }
 0x102   :  { %296 = vmatpush.bf16.msra.mxu1 %v225_v26  ;;  %315 = vmatpush.bf16.msra.mxu2 %v226_v27 }
 0x103   :  { %v143_v28 = vpop.permute.xlu1 %142  ;;  %v238_v1 = vpop.permute.xlu2 %237 }
 0x104   :  { %v141_v29 = vpop.permute.xlu0 %140 }
 0x105   :  { %v152_v36 = vsel %vm150_vm2, %v141_v29, %v143_v28 }
 0x106   :  { %297 = vmatpush.bf16.msra.mxu1 %v222_v5  ;;  %316 = vmatpush.bf16.msra.mxu2 %v223_v6  ;;  %v173_v44 = vmul.f32 %v167_v35, %v152_v36 }
 0x10b   :  { %v139_v37 = vpop.permute.xlu1 %138  ;;  %v253_v31 = vpop.permute.xlu2 %252 }
 0x10c   :  { %v151_v38 = vsel %vm150_vm2, %v139_v37, %v141_v29  ;;  %v149_v39 = vpop.permute.xlu0 %148  ;;  %v161_v57 = vsel %vm150_vm2, 0.0, %v139_v37 }
 0x10d   :  { %v172_v42 = vmul.f32 %v166_v33, %v151_v38  ;;  %v154_v43 = vsel %vm150_vm2, %v147_v19, %v149_v39  ;;  %v171_v60 = vmul.f32 %v165_v58, %v161_v57 }
 0x10e   :  { %v176_v45 = vmul.f32 %v167_v35, %v154_v43 }
 0x10f   :  { %v219_v46 = vpack.c.bf16 %v175_v41, %v172_v42  ;;  %v218_v62 = vpack.c.bf16 %v174_v61, %v171_v60 }
 0x110   :  { %v220_v47 = vpack.c.bf16 %v176_v45, %v173_v44 }
 0x111   :  { %298 = vmatpush.bf16.msra.mxu1 %v219_v46 }
 0x112   :  { %317 = vmatpush.bf16.msra.mxu2 %v220_v47 }
 0x113   :  { %v184_v50 = vpop.permute.xlu1 %183 }
 0x114   :  { %v192_v51 = vsel %vm189_vm1, %v184_v50, %v186_v11  ;;  %v178_v52 = vpop.permute.xlu0 %177  ;;  %375 = vmatmul.msk.bf16.vlgmr.msra.gmra.mxu1 %vm265_vm3, %v379_v48 }
 0x115   :  { %v215_v53 = vmul.f32 %v206_v49, %v192_v51  ;;  %v190_v54 = vsel %vm189_vm1, %v178_v52, %v180_v16  ;;  %377 = vmatmul.msk.bf16.vlgmr.msra.gmra.mxu2 %vm265_vm3, %v379_v48 }
 0x116   :  { %v212_v55 = vmul.f32 %v206_v49, %v190_v54 }
 0x118   :  { %v224_v56 = vpack.c.bf16 %v215_v53, %v212_v55 }
 0x11a   :  { %277 = vmatpush.bf16.msra.mxu0 %v224_v56  ;;  %381 = vmatpush.bf16.msra.mxu3 %v224_v56 }
 0x11b   :  { %v248_v18 = vpop.permute.xlu1 %247 }
 0x11e   :  { %278 = vmatpush.bf16.msra.mxu0 %v455_v7  ;;  %382 = vmatpush.bf16.msra.mxu3 %v455_v7  ;;  %v243_v7 = vpop.permute.xlu0 %242 }
 0x122   :  { %279 = vmatpush.bf16.msra.mxu0 %v218_v62  ;;  %383 = vmatpush.bf16.msra.mxu3 %v218_v62 }
 0x124   :  { %376 = vmatmul.msk.bf16.gmra.mxu1 %vm265_vm3, %v380_v63 }
 0x125   :  { %373 = vmatmul.msk.bf16.vlgmr.msra.gmra.mxu0 %vm265_vm3, %v379_v48  ;;  %374 = vmatmul.msk.bf16.vlgmr.msra.gmra.mxu3 %vm265_vm3, %v380_v63 }
 0x126   :  { %378 = vmatmul.msk.bf16.gmra.mxu2 %vm265_vm3, %v380_v63 }
 0x191   :  { %v300_v0 = vpop.f32.mrf.mxu1 }
 0x192   :  { %v301_v9 = vadd.f32 %v300_v0, %v238_v1 }
 0x194   :  { %v330_v15 = vmax.f32 %v301_v9, 0.0 }
 0x198   :  { %v319_v2 = vpop.f32.mrf.mxu2 }
 0x199   :  { %v320_v3 = vadd.f32 %v319_v2, %v238_v1  ;;  %v302_v4 = vpop.f32.mrf.mxu1 }
 0x19a   :  { %v303_v22 = vadd.f32 %v302_v4, %v243_v7 }
 0x19b   :  { %v331_v5 = vmax.f32 %v320_v3, 0.0 }
 0x19c   :  { %v333_v33 = vmax.f32 %v303_v22, 0.0 }
 0x19d   :  { %v342_v6 = vpack.c.bf16 %v331_v5, %v331_v5 }
 0x19f   :  { %351 = vst.msk [vmem:[%s533_s6 + $0x8] sm:$0xf] %vm350_vm4, %v342_v6 }
 0x1a0   :  { %v321_v8 = vpop.f32.mrf.mxu2 }
 0x1a1   :  { %v322_v10 = vadd.f32 %v321_v8, %v243_v7  ;;  %v305_v11 = vpop.f32.mrf.mxu1 }
 0x1a2   :  { %v281_v12 = vpop.f32.mrf.mxu0  ;;  %v306_v19 = vadd.f32 %v305_v11, %v248_v18 }
 0x1a3   :  { %v334_v13 = vmax.f32 %v322_v10, 0.0  ;;  %v282_v14 = vadd.f32 %v281_v12, %v238_v1 }
 0x1a4   :  { %v336_v27 = vmax.f32 %v306_v19, 0.0 }
 0x1a5   :  { %v344_v16 = vpack.c.bf16 %v334_v13, %v334_v13  ;;  %v329_v17 = vmax.f32 %v282_v14, 0.0 }
 0x1a7   :  { %353 = vst.msk [vmem:[%s533_s6 + $0x14] sm:$0xf] %vm350_vm4, %v344_v16  ;;  %v341_v20 = vpack.c.bf16 %v330_v15, %v329_v17 }
 0x1a8   :  { %v286_v21 = vpop.f32.mrf.mxu3 }
 0x1a9   :  { %349 = vst [vmem:[%s533_s6] sm:$0xff] %v341_v20  ;;  %v324_v23 = vpop.f32.mrf.mxu2  ;;  %v287_v24 = vadd.f32 %v286_v21, %v248_v18  ;;  %v307_v32 = vpop.f32.mrf.mxu1 }
 0x1aa   :  { %v325_v25 = vadd.f32 %v324_v23, %v248_v18  ;;  %v283_v26 = vpop.f32.mrf.mxu0  ;;  %v308_v37 = vadd.f32 %v307_v32, %v253_v31 }
 0x1ab   :  { %v335_v28 = vmax.f32 %v287_v24, 0.0  ;;  %v284_v29 = vadd.f32 %v283_v26, %v243_v7 }
 0x1ac   :  { %v337_v30 = vmax.f32 %v325_v25, 0.0  ;;  %v339_v43 = vmax.f32 %v308_v37, 0.0 }
 0x1ad   :  { %v345_v34 = vpack.c.bf16 %v336_v27, %v335_v28  ;;  %v332_v35 = vmax.f32 %v284_v29, 0.0 }
 0x1ae   :  { %v346_v36 = vpack.c.bf16 %v337_v30, %v337_v30 }
 0x1af   :  { %354 = vst [vmem:[%s533_s6 + $0x18] sm:$0xff] %v345_v34  ;;  %v343_v38 = vpack.c.bf16 %v333_v33, %v332_v35 }
 0x1b0   :  { %355 = vst.msk [vmem:[%s533_s6 + $0x20] sm:$0xf] %vm350_vm4, %v346_v36  ;;  %v288_v39 = vpop.f32.mrf.mxu3 }
 0x1b1   :  { %352 = vst [vmem:[%s533_s6 + $0xc] sm:$0xff] %v343_v38  ;;  %v289_v40 = vadd.f32 %v288_v39, %v253_v31  ;;  %v326_v41 = vpop.f32.mrf.mxu2 }
 0x1b2   :  { %v327_v42 = vadd.f32 %v326_v41, %v253_v31 }
 0x1b3   :  { %v338_v44 = vmax.f32 %v289_v40, 0.0 }
 0x1b4   :  { %v340_v45 = vmax.f32 %v327_v42, 0.0 }
 0x1b5   :  { %v347_v46 = vpack.c.bf16 %v339_v43, %v338_v44 }
 0x1b6   :  { %v348_v47 = vpack.c.bf16 %v340_v45, %v340_v45 }
 0x1b7   :  { %356 = vst [vmem:[%s533_s6 + $0x24] sm:$0xff] %v347_v46 }
 0x1b8   :  { %357 = vst.msk [vmem:[%s533_s6 + $0x2c] sm:$0xf] %vm350_vm4, %v348_v47 }

// kernel: net_conv_forward.3
= control target key start
LH: loop header
LB: loop body
LE: loop exit
PB: predicated region body
PF: predicated region fallthrough
CT: control target
= control target key end

     0   :  { %vm881_vm0 = vcmask 523264   ;;  %vm920_vm1 = vcmask 261120   ;;  %vm956_vm5 = vcmask 7168   ;;  %s1726_s1 = inlined_call_operand.vmem [shape: bf16[1280,64], index: 1, kind: input, shape index: {}]   ;;  %s1727_s2 = inlined_call_operand.vmem [shape: f32[1,64], index: 2, kind: input, shape index: {}]   ;;  %s1728_s0 = inlined_call_operand.vmem [shape: bf16[8,1280], index: 0, kind: input, shape index: {}]   ;;  %s1729_s4 = inlined_call_operand.vmem [shape: f32[1,32], index: 4, kind: input, shape index: {}]   ;;  %s1730_s3 = inlined_call_operand.vmem [shape: bf16[64,32], index: 3, kind: input, shape index: {}]   ;;  %s1731_s5 = inlined_call_operand.vmem [shape: bf16[32,1], index: 5, kind: input, shape index: {}]   ;;  %s1732_s6 = inlined_call_operand.<no memory space> [shape: f32[1,1], index: 6, kind: input, shape index: {}]   ;;  %s1733_s7 = inlined_call_operand.vmem [shape: f32[8,1], index: 7, kind: output, shape index: {}]  }
   0x1   :  { %v1315_v0 = vld [vmem:[%s1726_s1 + $0x38] sm:$0xff]  ;;  %v1314_v4 = vld [vmem:[%s1726_s1 + $0x30] sm:$0xff]  ;;  %v1313_v8 = vld [vmem:[%s1726_s1 + $0x28] sm:$0xff] }
   0x2   :  { %v1323_v1 = vld [vmem:[%s1726_s1 + $0x78] sm:$0xff]  ;;  %713 = vmatpush.bf16.msra.mxu0 %v1315_v0  ;;  %v1322_v5 = vld [vmem:[%s1726_s1 + $0x70] sm:$0xff]  ;;  %v1321_v9 = vld [vmem:[%s1726_s1 + $0x68] sm:$0xff] }
   0x3   :  { %v1331_v2 = vld [vmem:[%s1726_s1 + $0xb8] sm:$0xff]  ;;  %726 = vmatpush.bf16.msra.mxu1 %v1323_v1  ;;  %v1330_v6 = vld [vmem:[%s1726_s1 + $0xb0] sm:$0xff]  ;;  %v1329_v10 = vld [vmem:[%s1726_s1 + $0xa8] sm:$0xff] }
   0x4   :  { %v1339_v3 = vld [vmem:[%s1726_s1 + $0xf8] sm:$0xff]  ;;  %739 = vmatpush.bf16.msra.mxu2 %v1331_v2  ;;  %v1338_v7 = vld [vmem:[%s1726_s1 + $0xf0] sm:$0xff]  ;;  %v1337_v11 = vld [vmem:[%s1726_s1 + $0xe8] sm:$0xff] }
   0x5   :  { %752 = vmatpush.bf16.msra.mxu3 %v1339_v3  ;;  %v1312_v12 = vld [vmem:[%s1726_s1 + $0x20] sm:$0xff]  ;;  %v1311_v16 = vld [vmem:[%s1726_s1 + $0x18] sm:$0xff]  ;;  %v1310_v20 = vld [vmem:[%s1726_s1 + $0x10] sm:$0xff] }
   0x6   :  { %714 = vmatpush.bf16.msra.mxu0 %v1314_v4  ;;  %v1320_v13 = vld [vmem:[%s1726_s1 + $0x60] sm:$0xff]  ;;  %v1319_v17 = vld [vmem:[%s1726_s1 + $0x58] sm:$0xff]  ;;  %v1318_v21 = vld [vmem:[%s1726_s1 + $0x50] sm:$0xff] }
   0x7   :  { %727 = vmatpush.bf16.msra.mxu1 %v1322_v5  ;;  %v1328_v14 = vld [vmem:[%s1726_s1 + $0xa0] sm:$0xff]  ;;  %v1327_v18 = vld [vmem:[%s1726_s1 + $0x98] sm:$0xff]  ;;  %v1326_v22 = vld [vmem:[%s1726_s1 + $0x90] sm:$0xff] }
   0x8   :  { %740 = vmatpush.bf16.msra.mxu2 %v1330_v6  ;;  %v1336_v15 = vld [vmem:[%s1726_s1 + $0xe0] sm:$0xff]  ;;  %v1335_v19 = vld [vmem:[%s1726_s1 + $0xd8] sm:$0xff]  ;;  %v1334_v23 = vld [vmem:[%s1726_s1 + $0xd0] sm:$0xff] }
   0x9   :  { %753 = vmatpush.bf16.msra.mxu3 %v1338_v7  ;;  %v1309_v24 = vld [vmem:[%s1726_s1 + $0x8] sm:$0xff]  ;;  %v29_v28 = vld [vmem:[%s1728_s0] sm:$0xff]  ;;  %v1347_v34 = vld [vmem:[%s1726_s1 + $0x138] sm:$0xff] }
   0xa   :  { %715 = vmatpush.bf16.msra.mxu0 %v1313_v8  ;;  %v1317_v25 = vld [vmem:[%s1726_s1 + $0x48] sm:$0xff]  ;;  %v1308_v30 = vld [vmem:[%s1726_s1] sm:$0xff]  ;;  %v203_v32 = vunpack.c.l.b16 %v29_v28  ;;  %v204_v33 = vunpack.c.h.b16 %v29_v28  ;;  %v1355_v35 = vld [vmem:[%s1726_s1 + $0x178] sm:$0xff] }
   0xb   :  { %728 = vmatpush.bf16.msra.mxu1 %v1321_v9  ;;  %v1325_v26 = vld [vmem:[%s1726_s1 + $0x88] sm:$0xff]  ;;  %v1316_v31 = vld [vmem:[%s1726_s1 + $0x40] sm:$0xff]  ;;  %v1363_v40 = vld [vmem:[%s1726_s1 + $0x1b8] sm:$0xff] }
   0xc   :  { %741 = vmatpush.bf16.msra.mxu2 %v1329_v10  ;;  %v1333_v27 = vld [vmem:[%s1726_s1 + $0xc8] sm:$0xff]  ;;  %v1324_v36 = vld [vmem:[%s1726_s1 + $0x80] sm:$0xff]  ;;  %v1371_v41 = vld [vmem:[%s1726_s1 + $0x1f8] sm:$0xff]  ;;  %v213_v42 = vpack.c.b16 %v203_v32, %v203_v32  ;;  %v214_v43 = vpack.c.b16 %v204_v33, %v204_v33 }
   0xd   :  { %754 = vmatpush.bf16.msra.mxu3 %v1337_v11  ;;  %v30_v29 = vld [vmem:[%s1728_s0 + $0x8] sm:$0xff]  ;;  %v1332_v37 = vld [vmem:[%s1726_s1 + $0xc0] sm:$0xff]  ;;  %v1346_v44 = vld [vmem:[%s1726_s1 + $0x130] sm:$0xff] }
   0xe   :  { %716 = vmatpush.bf16.msra.mxu0 %v1312_v12  ;;  %v205_v38 = vunpack.c.l.b16 %v30_v29  ;;  %v206_v39 = vunpack.c.h.b16 %v30_v29  ;;  %v1354_v45 = vld [vmem:[%s1726_s1 + $0x170] sm:$0xff]  ;;  %v1345_v50 = vld [vmem:[%s1726_s1 + $0x128] sm:$0xff]  ;;  %v1344_v54 = vld [vmem:[%s1726_s1 + $0x120] sm:$0xff] }
   0xf   :  { %729 = vmatpush.bf16.msra.mxu1 %v1320_v13  ;;  %v1362_v48 = vld [vmem:[%s1726_s1 + $0x1b0] sm:$0xff]  ;;  %v1353_v51 = vld [vmem:[%s1726_s1 + $0x168] sm:$0xff]  ;;  %v1352_v55 = vld [vmem:[%s1726_s1 + $0x160] sm:$0xff] }
  0x10   :  { %742 = vmatpush.bf16.msra.mxu2 %v1328_v14  ;;  %v215_v46 = vpack.c.b16 %v205_v38, %v205_v38  ;;  %v216_v47 = vpack.c.b16 %v206_v39, %v206_v39  ;;  %v1370_v49 = vld [vmem:[%s1726_s1 + $0x1f0] sm:$0xff]  ;;  %v1361_v52 = vld [vmem:[%s1726_s1 + $0x1a8] sm:$0xff]  ;;  %v1360_v56 = vld [vmem:[%s1726_s1 + $0x1a0] sm:$0xff] }
  0x11   :  { %755 = vmatpush.bf16.msra.mxu3 %v1336_v15  ;;  %v1369_v53 = vld [vmem:[%s1726_s1 + $0x1e8] sm:$0xff]  ;;  %v1368_v57 = vld [vmem:[%s1726_s1 + $0x1e0] sm:$0xff]  ;;  %v1343_v58 = vld [vmem:[%s1726_s1 + $0x118] sm:$0xff] }
  0x12   :  { %717 = vmatpush.bf16.msra.mxu0 %v1311_v16  ;;  %v1351_v59 = vld [vmem:[%s1726_s1 + $0x158] sm:$0xff]  ;;  %v1342_v62 = vld [vmem:[%s1726_s1 + $0x110] sm:$0xff]  ;;  %v1341_v2 = vld [vmem:[%s1726_s1 + $0x108] sm:$0xff] }
  0x13   :  { %730 = vmatpush.bf16.msra.mxu1 %v1319_v17  ;;  %v1359_v60 = vld [vmem:[%s1726_s1 + $0x198] sm:$0xff]  ;;  %v1350_v63 = vld [vmem:[%s1726_s1 + $0x150] sm:$0xff]  ;;  %v1349_v3 = vld [vmem:[%s1726_s1 + $0x148] sm:$0xff] }
  0x14   :  { %743 = vmatpush.bf16.msra.mxu2 %v1327_v18  ;;  %v1367_v61 = vld [vmem:[%s1726_s1 + $0x1d8] sm:$0xff]  ;;  %v1358_v0 = vld [vmem:[%s1726_s1 + $0x190] sm:$0xff]  ;;  %v1357_v5 = vld [vmem:[%s1726_s1 + $0x188] sm:$0xff] }
  0x15   :  { %756 = vmatpush.bf16.msra.mxu3 %v1335_v19  ;;  %v1366_v1 = vld [vmem:[%s1726_s1 + $0x1d0] sm:$0xff]  ;;  %v1365_v6 = vld [vmem:[%s1726_s1 + $0x1c8] sm:$0xff]  ;;  %v32_v7 = vld [vmem:[%s1728_s0 + $0x18] sm:$0xff] }
  0x16   :  { %718 = vmatpush.bf16.msra.mxu0 %v1310_v20  ;;  %v31_v4 = vld [vmem:[%s1728_s0 + $0x10] sm:$0xff]  ;;  %v1340_v10 = vld [vmem:[%s1726_s1 + $0x100] sm:$0xff]  ;;  %v1379_v12 = vld [vmem:[%s1726_s1 + $0x238] sm:$0xff]  ;;  %v209_v16 = vunpack.c.l.b16 %v32_v7  ;;  %v210_v17 = vunpack.c.h.b16 %v32_v7 }
  0x17   :  { %731 = vmatpush.bf16.msra.mxu1 %v1318_v21  ;;  %v207_v8 = vunpack.c.l.b16 %v31_v4  ;;  %v208_v9 = vunpack.c.h.b16 %v31_v4  ;;  %v1348_v11 = vld [vmem:[%s1726_s1 + $0x140] sm:$0xff]  ;;  %v1387_v13 = vld [vmem:[%s1726_s1 + $0x278] sm:$0xff]  ;;  %v1378_v20 = vld [vmem:[%s1726_s1 + $0x230] sm:$0xff] }
  0x18   :  { %744 = vmatpush.bf16.msra.mxu2 %v1326_v22  ;;  %v1356_v14 = vld [vmem:[%s1726_s1 + $0x180] sm:$0xff]  ;;  %v1386_v21 = vld [vmem:[%s1726_s1 + $0x270] sm:$0xff]  ;;  %v219_v22 = vpack.c.b16 %v209_v16, %v209_v16  ;;  %v1375_v28 = vld [vmem:[%s1726_s1 + $0x218] sm:$0xff]  ;;  %v12_v16 = vstv %s1732_s6 }
  0x19   :  { %757 = vmatpush.bf16.msra.mxu3 %v1334_v23  ;;  %v1364_v15 = vld [vmem:[%s1726_s1 + $0x1c0] sm:$0xff]  ;;  %v217_v18 = vpack.c.b16 %v207_v8, %v207_v8  ;;  %v218_v19 = vpack.c.b16 %v208_v9, %v208_v9  ;;  %v220_v23 = vpack.c.b16 %v210_v17, %v210_v17  ;;  %v1383_v29 = vld [vmem:[%s1726_s1 + $0x258] sm:$0xff]  ;;  %v1373_v32 = vld [vmem:[%s1726_s1 + $0x208] sm:$0xff]  ;;  %13 = vst [vmem:[#allocation2] sm:$0x1] %v12_v16 }
  0x1a   :  { %719 = vmatpush.bf16.msra.mxu0 %v1309_v24  ;;  %v1377_v24 = vld [vmem:[%s1726_s1 + $0x228] sm:$0xff]  ;;  %v1380_v38 = vld [vmem:[%s1726_s1 + $0x240] sm:$0xff] }
  0x1b   :  { %732 = vmatpush.bf16.msra.mxu1 %v1317_v25  ;;  %v1385_v25 = vld [vmem:[%s1726_s1 + $0x268] sm:$0xff]  ;;  %v1395_v17 = vld [vmem:[%s1729_s4] ss:$0 sm:$0xff] }
  0x1c   :  { %745 = vmatpush.bf16.msra.mxu2 %v1325_v26  ;;  %v1376_v26 = vld [vmem:[%s1726_s1 + $0x220] sm:$0xff]  ;;  %v1381_v33 = vld [vmem:[%s1726_s1 + $0x248] sm:$0xff] }
  0x1d   :  { %758 = vmatpush.bf16.msra.mxu3 %v1333_v27  ;;  %v1384_v27 = vld [vmem:[%s1726_s1 + $0x260] sm:$0xff] }
  0x1e   :  { %720 = vmatpush.bf16.msra.mxu0 %v1308_v30  ;;  %v1374_v30 = vld [vmem:[%s1726_s1 + $0x210] sm:$0xff] }
  0x1f   :  { %733 = vmatpush.bf16.msra.mxu1 %v1316_v31  ;;  %v1382_v31 = vld [vmem:[%s1726_s1 + $0x250] sm:$0xff] }
  0x20   :  { %746 = vmatpush.bf16.msra.mxu2 %v1324_v36 }
  0x21   :  { %759 = vmatpush.bf16.msra.mxu3 %v1332_v37  ;;  %721 = vmatmul.bf16.vlgmr.msra.gmra.mxu0 %v213_v42  ;;  %v1372_v37 = vld [vmem:[%s1726_s1 + $0x200] sm:$0xff] }
  0x22   :  { %765 = vmatpush.bf16.msrb.mxu0 %v1347_v34  ;;  %734 = vmatmul.bf16.vlgmr.msra.gmra.mxu1 %v214_v43  ;;  %v33_v34 = vld [vmem:[%s1728_s0 + $0x20] sm:$0xff] }
  0x23   :  { %778 = vmatpush.bf16.msrb.mxu1 %v1355_v35  ;;  %747 = vmatmul.bf16.vlgmr.msra.gmra.mxu2 %v215_v46  ;;  %v211_v35 = vunpack.c.l.b16 %v33_v34  ;;  %v212_v36 = vunpack.c.h.b16 %v33_v34 }
  0x24   :  { %791 = vmatpush.bf16.msrb.mxu2 %v1363_v40  ;;  %760 = vmatmul.bf16.vlgmr.msra.gmra.mxu3 %v216_v47 }
  0x25   :  { %804 = vmatpush.bf16.msrb.mxu3 %v1371_v41  ;;  %v221_v39 = vpack.c.b16 %v211_v35, %v211_v35  ;;  %v222_v40 = vpack.c.b16 %v212_v36, %v212_v36 }
  0x26   :  { %766 = vmatpush.bf16.msrb.mxu0 %v1346_v44 }
  0x27   :  { %779 = vmatpush.bf16.msrb.mxu1 %v1354_v45  ;;  %v1391_v45 = vld [vmem:[%s1730_s3 + $0x18] sm:$0xff] }
  0x28   :  { %792 = vmatpush.bf16.msrb.mxu2 %v1362_v48  ;;  %v1390_v48 = vld [vmem:[%s1730_s3 + $0x10] sm:$0xff] }
  0x29   :  { %805 = vmatpush.bf16.msrb.mxu3 %v1370_v49 }
  0x2a   :  { %767 = vmatpush.bf16.msrb.mxu0 %v1345_v50 }
  0x2b   :  { %780 = vmatpush.bf16.msrb.mxu1 %v1353_v51  ;;  %v1394_v51 = vld [vmem:[%s1727_s2] ss:$0 sm:$0xff] }
  0x2c   :  { %793 = vmatpush.bf16.msrb.mxu2 %v1361_v52  ;;  %v1389_v52 = vld [vmem:[%s1730_s3 + $0x8] sm:$0xff] }
  0x2d   :  { %806 = vmatpush.bf16.msrb.mxu3 %v1369_v53 }
  0x2e   :  { %768 = vmatpush.bf16.msrb.mxu0 %v1344_v54 }
  0x2f   :  { %781 = vmatpush.bf16.msrb.mxu1 %v1352_v55 }
  0x30   :  { %794 = vmatpush.bf16.msrb.mxu2 %v1360_v56  ;;  %v1388_v56 = vld [vmem:[%s1730_s3] sm:$0xff] }
  0x31   :  { %807 = vmatpush.bf16.msrb.mxu3 %v1368_v57 }
  0x32   :  { %769 = vmatpush.bf16.msrb.mxu0 %v1343_v58  ;;  %v1393_v58 = vld [vmem:[%s1731_s5 + $0x8] sm:$0xff] }
  0x33   :  { %782 = vmatpush.bf16.msrb.mxu1 %v1351_v59 }
  0x34   :  { %795 = vmatpush.bf16.msrb.mxu2 %v1359_v60 }
  0x35   :  { %808 = vmatpush.bf16.msrb.mxu3 %v1367_v61 }
  0x36   :  { %770 = vmatpush.bf16.msrb.mxu0 %v1342_v62  ;;  %v1392_v62 = vld [vmem:[%s1731_s5] sm:$0xff] }
  0x37   :  { %783 = vmatpush.bf16.msrb.mxu1 %v1350_v63 }
  0x38   :  { %796 = vmatpush.bf16.msrb.mxu2 %v1358_v0 }
  0x39   :  { %809 = vmatpush.bf16.msrb.mxu3 %v1366_v1 }
  0x3a   :  { %771 = vmatpush.bf16.msrb.mxu0 %v1341_v2 }
  0x3b   :  { %784 = vmatpush.bf16.msrb.mxu1 %v1349_v3 }
  0x3c   :  { %797 = vmatpush.bf16.msrb.mxu2 %v1357_v5 }
  0x3d   :  { %810 = vmatpush.bf16.msrb.mxu3 %v1365_v6 }
  0x3e   :  { %772 = vmatpush.bf16.msrb.mxu0 %v1340_v10 }
  0x3f   :  { %785 = vmatpush.bf16.msrb.mxu1 %v1348_v11 }
  0x40   :  { %798 = vmatpush.bf16.msrb.mxu2 %v1356_v14 }
  0x41   :  { %811 = vmatpush.bf16.msrb.mxu3 %v1364_v15  ;;  %773 = vmatmul.bf16.vlgmr.msrb.gmra.mxu0 %v217_v18 }
  0x42   :  { %817 = vmatpush.bf16.msra.mxu0 %v1379_v12  ;;  %786 = vmatmul.bf16.vlgmr.msrb.gmra.mxu1 %v218_v19 }
  0x43   :  { %830 = vmatpush.bf16.msra.mxu1 %v1387_v13  ;;  %799 = vmatmul.bf16.vlgmr.msrb.gmra.mxu2 %v219_v22 }
  0x44   :  { %812 = vmatmul.bf16.vlgmr.msrb.gmra.mxu3 %v220_v23  ;;  %889 = vmatpush.bf16.msra.mxu2 %v1391_v45  ;;  %v1396_v23 = vld [vmem:[#allocation2] ss:$0 sm:$0xff] }
  0x45   :  { %930 = vmatpush.bf16.msra.mxu3 %v1393_v58 }
  0x46   :  { %818 = vmatpush.bf16.msra.mxu0 %v1378_v20 }
  0x47   :  { %831 = vmatpush.bf16.msra.mxu1 %v1386_v21 }
  0x48   :  { %890 = vmatpush.bf16.msra.mxu2 %v1390_v48 }
  0x49   :  { %931 = vmatpush.bf16.msra.mxu3 %v1392_v62 }
  0x4a   :  { %819 = vmatpush.bf16.msra.mxu0 %v1377_v24 }
  0x4b   :  { %832 = vmatpush.bf16.msra.mxu1 %v1385_v25 }
  0x4c   :  { %891 = vmatpush.bf16.msra.mxu2 %v1389_v52 }
  0x4e   :  { %820 = vmatpush.bf16.msra.mxu0 %v1376_v26 }
  0x4f   :  { %833 = vmatpush.bf16.msra.mxu1 %v1384_v27 }
  0x50   :  { %892 = vmatpush.bf16.msra.mxu2 %v1388_v56 }
  0x52   :  { %821 = vmatpush.bf16.msra.mxu0 %v1375_v28 }
  0x53   :  { %834 = vmatpush.bf16.msra.mxu1 %v1383_v29 }
  0x56   :  { %822 = vmatpush.bf16.msra.mxu0 %v1374_v30 }
  0x57   :  { %835 = vmatpush.bf16.msra.mxu1 %v1382_v31 }
  0x5a   :  { %823 = vmatpush.bf16.msra.mxu0 %v1373_v32 }
  0x5b   :  { %836 = vmatpush.bf16.msra.mxu1 %v1381_v33 }
  0x5e   :  { %824 = vmatpush.bf16.msra.mxu0 %v1372_v37 }
  0x5f   :  { %837 = vmatpush.bf16.msra.mxu1 %v1380_v38 }
  0x61   :  { %825 = vmatmul.bf16.vlgmr.msra.gmra.mxu0 %v221_v39 }
  0x62   :  { %838 = vmatmul.bf16.vlgmr.msra.gmra.mxu1 %v222_v40 }
  0x9e   :  { %v722_v41 = vpop.f32.mrf.mxu0 }
  0x9f   :  { %v735_v42 = vpop.f32.mrf.mxu1  ;;  %v723_v53 = vadd.f32 %v1394_v51, %v722_v41 }
  0xa1   :  { %v736_v57 = vadd.f32 %v735_v42, %v723_v53 }
  0xa6   :  { %v748_v43 = vpop.f32.mrf.mxu2  ;;  %v724_v46 = vpop.f32.mrf.mxu0 }
  0xa7   :  { %v761_v44 = vpop.f32.mrf.mxu3  ;;  %v737_v47 = vpop.f32.mrf.mxu1  ;;  %v749_v59 = vadd.f32 %v748_v43, %v736_v57 }
  0xa9   :  { %v762_v1 = vadd.f32 %v761_v44, %v749_v59 }
  0xae   :  { %v750_v49 = vpop.f32.mrf.mxu2 }
  0xaf   :  { %v763_v50 = vpop.f32.mrf.mxu3 }
  0xbe   :  { %v774_v54 = vpop.f32.mrf.mxu0 }
  0xbf   :  { %v787_v55 = vpop.f32.mrf.mxu1  ;;  %v775_v2 = vadd.f32 %v774_v54, %v762_v1 }
  0xc1   :  { %v788_v5 = vadd.f32 %v787_v55, %v775_v2 }
  0xc6   :  { %v776_v60 = vpop.f32.mrf.mxu0  ;;  %v800_v63 = vpop.f32.mrf.mxu2 }
  0xc7   :  { %v789_v61 = vpop.f32.mrf.mxu1  ;;  %v813_v0 = vpop.f32.mrf.mxu3  ;;  %v801_v6 = vadd.f32 %v800_v63, %v788_v5 }
  0xc9   :  { %v814_v7 = vadd.f32 %v813_v0, %v801_v6 }
  0xce   :  { %v802_v3 = vpop.f32.mrf.mxu2 }
  0xcf   :  { %v815_v4 = vpop.f32.mrf.mxu3 }
  0xde   :  { %v826_v8 = vpop.f32.mrf.mxu0 }
  0xdf   :  { %v839_v9 = vpop.f32.mrf.mxu1  ;;  %v827_v10 = vadd.f32 %v826_v8, %v814_v7 }
  0xe1   :  { %v840_v11 = vadd.f32 %v839_v9, %v827_v10 }
  0xe3   :  { %v843_v12 = vmax.f32 %v840_v11, 0.0 }
  0xe5   :  { %v844_v13 = vpack.c.bf16 %v843_v12, %v843_v12 }
  0xe6   :  { %v828_v14 = vpop.f32.mrf.mxu0 }
  0xe7   :  { %v841_v15 = vpop.f32.mrf.mxu1  ;;  %1298 = vmatmul.msk.bf16.vlgmr.msra.gmra.mxu2 %vm881_vm0, %v844_v13 }
 0x16a   :  { %v894_v18 = vpop.f32.mrf.mxu2 }
 0x16b   :  { %v895_v19 = vadd.f32 %v1395_v17, %v894_v18 }
 0x16d   :  { %v898_v20 = vmax.f32 %v895_v19, 0.0 }
 0x16f   :  { %v899_v21 = vpack.c.bf16 %v898_v20, %v898_v20 }
 0x171   :  { %1307 = vmatmul.msk.bf16.vlgmr.msra.gmra.mxu3 %vm920_vm1, %v899_v21 }
 0x172   :  { %v896_v22 = vpop.f32.mrf.mxu2 }
 0x1f4   :  { %v933_v24 = vpop.f32.mrf.mxu3 }
 0x1f5   :  { %v934_v25 = vadd.f32 %v1396_v23, %v933_v24 }
 0x1f7   :  { %v937_v26 = vsub.f32 0.0, %v934_v25 }
 0x1f9   :  { %v938_v27 = vmul.f32 1.442695, %v937_v26 }
 0x1fb   :  { %1397 = vpow2.f32 %v938_v27 }
 0x1fc   :  { %v935_v28 = vpop.f32.mrf.mxu3 }
 0x201   :  { %v1398_v29 = vpop.eup %1397 }
 0x202   :  { %v940_v30 = vadd.f32 1.0, %v1398_v29 }
 0x204   :  { %1399 = vrcp.f32 %v940_v30  ;;  %v952_v34 = vand.u32 2147483648, %v940_v30  ;;  %v950_v36 = vand.u32 2147483647, %v940_v30  ;;  %vm946_vm3 = vweird.f32 %v940_v30 }
 0x206   :  { %v953_v38 = vor.u32 1.1754944e-38, %v952_v34  ;;  %vm951_vm6 = vcmp.eq.f32.partialorder %v950_v36, 8.507059e+37 }
 0x20a   :  { %v1400_v31 = vpop.eup %1399 }
 0x20b   :  { %v942_v32 = vmul.f32 %v1400_v31, %v940_v30  ;;  %vm947_vm2 = vweird.f32 %v1400_v31 }
 0x20c   :  { %vm948_vm4 = vmor %vm946_vm3, %vm947_vm2 }
 0x20d   :  { %v943_v33 = vsub.f32 1.0, %v942_v32 }
 0x20f   :  { %v944_v35 = vmul.f32 %v1400_v31, %v943_v33 }
 0x211   :  { %v945_v37 = vadd.f32 %v1400_v31, %v944_v35 }
 0x213   :  { %v949_v39 = vsel %vm948_vm4, %v1400_v31, %v945_v37 }
 0x214   :  { %v954_v40 = vsel %vm951_vm6, %v953_v38, %v949_v39 }
 0x215   :  { %957 = vst.msk [vmem:[%s1733_s7] sm:$0xff] %vm956_vm5, %v954_v40 }

</bundles_post_ra>
